<compile_context>
chip_gen: v6e
topology: v6e:2x2x1
jax: 0.10.0
libtpu: 0.0.40
codegen_flags: <defaults>
</compile_context>

<pallas_src>
import functools
import math

import jax
import jax.numpy as jnp
from jax.experimental import pallas as pl
from jax.experimental.pallas import tpu as pltpu


_EPS = 1e-12  # clamp on the *squared* norm (norm floor ~1e-6). The original
              # torch code has no clamp at all; this only protects pathological
              # all-zero rows from inf/NaN.

_VMEM_TILE_BUDGET = 36 * 1024 * 1024   # bytes of tile working set we allow
_VMEM_LIMIT_BYTES = 48 * 1024 * 1024   # scoped-VMEM limit (headroom on v7x 64 MiB)


def _norm_ip_kernel(feat_ref, w_ref, cos_ref, logits_ref, wnorm_ref,
                    inv_w_sc, *, scale):
    """One (TM, TN) tile of cos and logits = scale * cos.

    feat_ref  : (TM, D)  pre-normalized feature rows, MXU dtype (bf16)
    w_ref     : (TN, D)  raw weight rows, MXU dtype (bf16)
    cos_ref   : (TM, TN) f32 cosine tile
    logits_ref: (TM, TN) f32 scale * cos tile
    wnorm_ref : (1, TN)  f32 lane-dense weight L2 norms for this class tile
    inv_w_sc  : (1, TN)  f32 VMEM scratch caching 1/||w|| across batch tiles
    """
    i = pl.program_id(1)  # batch tile index (inner, "arbitrary")

    # Weight-norm work runs once per weight tile: the class tile is constant
    # across the inner batch axis, so only the i == 0 step computes it; the
    # result is cached in VMEM scratch for the remaining batch tiles.
    @pl.when(i == 0)
    def _():
        w32 = w_ref[...].astype(jnp.float32)
        wsq = w32 * w32
        # Lane-dense (1, TN) sum-of-squares via a tiny ones-row matmul: gives
        # both the broadcast-over-columns scale and the wnorm output with no
        # transpose and no per-step repetition.
        ones_row = jnp.ones((1, wsq.shape[1]), jnp.float32)
        w_sq = jax.lax.dot_general(
            ones_row, wsq,
            dimension_numbers=(((1,), (1,)), ((), ())),
            preferred_element_type=jnp.float32)               # (1, TN)
        inv_w_sc[...] = jax.lax.rsqrt(jnp.maximum(w_sq, _EPS))
        wnorm_ref[...] = jnp.sqrt(w_sq)

    # Steady state: one bf16 MXU matmul (both operands contract on their lane
    # axis, so no weight-tile transpose is materialized) + broadcast scales.
    raw = jax.lax.dot_general(
        feat_ref[...], w_ref[...],
        dimension_numbers=(((1,), (1,)), ((), ())),
        preferred_element_type=jnp.float32)                   # (TM, TN)

    cos = raw * inv_w_sc[...]
    cos_ref[...] = cos
    logits_ref[...] = cos * scale


def _round_up(x, m):
    return ((x + m - 1) // m) * m


def _pick_tiles(B, C, D, mxu_bytes):
    """Pick (tm, tn) so the double-buffered working set fits the VMEM budget.

    Preference: keep the whole batch resident (single batch tile => feat is
    read from HBM exactly once), then the largest class tile (fewer grid
    steps, wider lane-dense output stores).
    """
    tm_full = _round_up(B, 8)
    tn_cap = _round_up(C, 128)

    def fits(tm, tn):
        need = (2 * tn * D * mxu_bytes        # weight tile, double-buffered
                + 2 * tm * D * mxu_bytes      # feat tile (resident; 2x worst case)
                + 2 * 2 * tm * tn * 4         # cos + logits f32, double-buffered
                + 8 * tn * 4)                 # wnorm out + inv_w scratch
        return need <= _VMEM_TILE_BUDGET

    tm_cands = [tm_full] + [t for t in (2048, 1024, 512, 256, 128, 64, 32, 16, 8)
                            if t < tm_full]
    tn_cands = [t for t in (1024, 512, 256, 128) if t <= tn_cap] or [tn_cap]
    for tm in tm_cands:
        for tn in tn_cands:
            if fits(tm, tn):
                return tm, tn
    # TODO(synk): for very large D (>~8K bf16) add a D-reduction grid axis with
    # an f32 accumulator instead of shrinking tiles further.
    return tm_cands[-1], tn_cands[-1]


def normalized_inner_product_with_scale(feat, weights, label, scale=20.0,
                                        mxu_dtype=jnp.bfloat16):
    """JAX/Pallas equivalent of NormalizedInnerProductWithScale.forward.

    Returns (cos, logits, avg_theta, min_theta, max_theta, stdv_theta,
             avg_w_norm, avg_x_norm), matching the PyTorch module's tuple.
    """
    B, D = feat.shape
    C, D2 = weights.shape
    assert D == D2

    # ---- feature side (tiny: B*D): exact f32 normalization in the wrapper ----
    f32 = feat.astype(jnp.float32)
    x_sq = jnp.sum(f32 * f32, axis=-1, keepdims=True)         # (B, 1)
    xnorm = jnp.sqrt(x_sq)[:, 0]                               # (B,)
    feat_n = (f32 * jax.lax.rsqrt(jnp.maximum(x_sq, _EPS))).astype(mxu_dtype)

    # ---- tile selection & (minimal) padding ----
    tm, tn = _pick_tiles(B, C, D, jnp.dtype(mxu_dtype).itemsize)
    b_pad = _round_up(B, tm)
    c_pad = _round_up(C, tn)

    if b_pad != B:
        feat_n = jnp.pad(feat_n, ((0, b_pad - B), (0, 0)))
    # Cast weights to the MXU dtype (halves the dominant HBM read when the
    # parameter arrives as f32; a no-op if it is already bf16) and pad the
    # class axis only if tn does not divide C.
    # TODO(synk): in a real module, store the parameter pre-cast/pre-padded at
    # init time so this copy stays out of the per-step hot path.
    w_mxu = weights.astype(mxu_dtype)
    if c_pad != C:
        w_mxu = jnp.pad(w_mxu, ((0, c_pad - C), (0, 0)))

    nj = c_pad // tn  # class tiles (outer, "parallel": megacore splits weights)
    ni = b_pad // tm  # batch tiles (inner, "arbitrary"; usually 1 => feat resident)

    kernel = functools.partial(_norm_ip_kernel, scale=float(scale))

    cos_p, logits_p, wnorm_p = pl.pallas_call(
        kernel,
        out_shape=(
            jax.ShapeDtypeStruct((b_pad, c_pad), jnp.float32),
            jax.ShapeDtypeStruct((b_pad, c_pad), jnp.float32),
            jax.ShapeDtypeStruct((1, c_pad), jnp.float32),
        ),
        grid=(nj, ni),
        in_specs=[
            pl.BlockSpec((tm, D), lambda j, i: (i, 0)),    # feat (resident if ni==1)
            pl.BlockSpec((tn, D), lambda j, i: (j, 0)),    # weights (resident over i)
        ],
        out_specs=(
            pl.BlockSpec((tm, tn), lambda j, i: (i, j)),   # cos
            pl.BlockSpec((tm, tn), lambda j, i: (i, j)),   # logits
            pl.BlockSpec((1, tn), lambda j, i: (0, j)),    # wnorm (lane-dense)
        ),
        scratch_shapes=[pltpu.VMEM((1, tn), jnp.float32)],  # cached 1/||w||
        compiler_params=pltpu.CompilerParams(
            dimension_semantics=("parallel", "arbitrary"),
            vmem_limit_bytes=_VMEM_LIMIT_BYTES),
    )(feat_n, w_mxu)

    if b_pad != B or c_pad != C:
        cos = cos_p[:B, :C]
        logits = logits_p[:B, :C]
    else:
        cos, logits = cos_p, logits_p
    wnorm = wnorm_p[0, :C]

    avg_w_norm = jnp.mean(wnorm)
    avg_x_norm = jnp.mean(xnorm)

    # theta_i = acos(cos[i, label_i]) in degrees
    label = label.astype(jnp.int32)
    cos_at_label = jnp.take_along_axis(cos, label.reshape(-1, 1), axis=1)[:, 0]
    thetas = jnp.arccos(jnp.clip(cos_at_label, -1.0, 1.0)) / math.pi * 180.0
    max_theta = jnp.max(thetas)
    min_theta = jnp.min(thetas)
    avg_theta = jnp.mean(thetas)
    stdv_theta = jnp.std(thetas, ddof=1)  # (n-1)-divisor, matches get_stddev

    return (cos, logits, avg_theta, min_theta, max_theta, stdv_theta,
            avg_w_norm, avg_x_norm)


if __name__ == "__main__":
    feature_dim = 32
    class_num = 16
    batch = 8
    scale = 20.0

    key = jax.random.PRNGKey(0)
    k_feat, k_w, k_lbl = jax.random.split(key, 3)

    feat = jax.random.normal(k_feat, (batch, feature_dim), dtype=jnp.float32)

    # xavier_uniform_ for a (class_num, feature_dim) parameter:
    # bound = sqrt(6 / (fan_in + fan_out)) with fan_in=feature_dim, fan_out=class_num
    bound = math.sqrt(6.0 / (feature_dim + class_num))
    weights = jax.random.uniform(k_w, (class_num, feature_dim),
                                 minval=-bound, maxval=bound, dtype=jnp.float32)

    label = jax.random.randint(k_lbl, (batch,), 0, class_num, dtype=jnp.int32)

    out = normalized_inner_product_with_scale(feat, weights, label, scale=scale)
    out = jax.block_until_ready(out)

    (cos, logits, avg_theta, min_theta, max_theta, stdv_theta,
     avg_w_norm, avg_x_norm) = out

    # --- sanity checks ---
    # (a) tight check against a reference built from the same bf16-rounded
    #     operands the MXU consumes (isolates kernel correctness).
    nf = feat / jnp.linalg.norm(feat, axis=-1, keepdims=True)
    nf_b = nf.astype(jnp.bfloat16).astype(jnp.float32)
    w_b = weights.astype(jnp.bfloat16).astype(jnp.float32)
    nw_b = w_b / jnp.linalg.norm(w_b, axis=-1, keepdims=True)
    cos_ref_b = jnp.dot(nf_b, nw_b.T, precision=jax.lax.Precision.HIGHEST)
    # (b) loose check against the full-f32 reference (bf16 operand rounding).
    nw = weights / jnp.linalg.norm(weights, axis=-1, keepdims=True)
    cos_ref = jnp.dot(nf, nw.T, precision=jax.lax.Precision.HIGHEST)

    assert cos.shape == (batch, class_num)
    assert logits.shape == (batch, class_num)
    assert jnp.allclose(cos, cos_ref_b, atol=2e-3), "cos mismatch (bf16 ref)"
    assert jnp.allclose(cos, cos_ref, atol=3e-2), "cos mismatch (f32 ref)"
    assert jnp.allclose(logits, scale * cos, atol=1e-5), "logits != scale*cos"
    assert bool(jnp.isfinite(stdv_theta)), "stdv_theta not finite"

    print('Avg weight norm is {:.6f}, avg feature norm i {:.6f}'.format(
        float(avg_w_norm), float(avg_x_norm)))
    print('Now stdv of thetas is {:.4f}'.format(float(stdv_theta)))
    print("KERNEL_OK")
</pallas_src>

<mosaic_0001>
module attributes {stable_mosaic.version = 11 : i64} {
  func.func @_norm_ip_kernel(%arg0: i32, %arg1: i32, %arg2: memref<8x32xbf16, #tpu.memory_space<vmem>>, %arg3: memref<128x32xbf16, #tpu.memory_space<vmem>>, %arg4: memref<8x128xf32, #tpu.memory_space<vmem>>, %arg5: memref<8x128xf32, #tpu.memory_space<vmem>>, %arg6: memref<1x128xf32, #tpu.memory_space<vmem>>, %arg7: memref<1x128xf32, #tpu.memory_space<vmem>>) attributes {dimension_semantics = [#tpu.dimension_semantics<parallel>, #tpu.dimension_semantics<arbitrary>], iteration_bounds = array<i64: 1, 1>, scalar_prefetch = 0 : i64, scratch_operands = 1 : i64, tpu.core_type = #tpu.core_type<tc>, window_params = [{transform_indices = @transform_0, window_bounds = array<i64: 8, 32>}, {transform_indices = @transform_1, window_bounds = array<i64: 128, 32>}, {transform_indices = @transform_2, window_bounds = array<i64: 8, 128>}, {transform_indices = @transform_3, window_bounds = array<i64: 8, 128>}, {transform_indices = @transform_4, window_bounds = array<i64: 1, 128>}]} {
    %c0_i32 = arith.constant 0 : i32
    %0 = arith.cmpi eq, %arg1, %c0_i32 : i32
    %1 = arith.extui %0 : i1 to i32
    %c0_i32_0 = arith.constant 0 : i32
    %2 = arith.cmpi ne, %1, %c0_i32_0 : i32
    scf.if %2 {
      %c0_11 = arith.constant 0 : index
      %c0_12 = arith.constant 0 : index
      %13 = vector.load %arg3[%c0_11, %c0_12] : memref<128x32xbf16, #tpu.memory_space<vmem>>, vector<128x32xbf16>
      %14 = arith.extf %13 : vector<128x32xbf16> to vector<128x32xf32>
      %15 = arith.mulf %14, %14 : vector<128x32xf32>
      %cst_13 = arith.constant 1.000000e+00 : f32
      %16 = vector.broadcast %cst_13 : f32 to vector<1x32xf32>
      %cst_14 = arith.constant dense<0.000000e+00> : vector<1x128xf32>
      %17 = tpu.matmul %16, %15, %cst_14 {dimension_numbers = #tpu.dot_dimension_numbers<[1], [1], [0], [0], [0, 0, 1, 0], [], []>} : vector<1x32xf32>, vector<128x32xf32>, vector<1x128xf32> -> vector<1x128xf32>
      %cst_15 = arith.constant 9.99999996E-13 : f32
      %18 = vector.broadcast %cst_15 : f32 to vector<1x128xf32>
      %19 = arith.maximumf %17, %18 : vector<1x128xf32>
      %20 = math.rsqrt %19 : vector<1x128xf32>
      %c0_16 = arith.constant 0 : index
      %c0_17 = arith.constant 0 : index
      %21 = vector.load %arg7[%c0_16, %c0_17] : memref<1x128xf32, #tpu.memory_space<vmem>>, vector<1x128xf32>
      tpu.vector_store %arg7[%c0_16, %c0_17], %20 {strides = array<i32>} : memref<1x128xf32, #tpu.memory_space<vmem>>, vector<1x128xf32>,
      %22 = math.sqrt %17 : vector<1x128xf32>
      %c0_18 = arith.constant 0 : index
      %c0_19 = arith.constant 0 : index
      %23 = vector.load %arg6[%c0_18, %c0_19] : memref<1x128xf32, #tpu.memory_space<vmem>>, vector<1x128xf32>
      tpu.vector_store %arg6[%c0_18, %c0_19], %22 {strides = array<i32>} : memref<1x128xf32, #tpu.memory_space<vmem>>, vector<1x128xf32>,
    } else {
    }
    %c0 = arith.constant 0 : index
    %c0_1 = arith.constant 0 : index
    %3 = vector.load %arg2[%c0, %c0_1] : memref<8x32xbf16, #tpu.memory_space<vmem>>, vector<8x32xbf16>
    %c0_2 = arith.constant 0 : index
    %c0_3 = arith.constant 0 : index
    %4 = vector.load %arg3[%c0_2, %c0_3] : memref<128x32xbf16, #tpu.memory_space<vmem>>, vector<128x32xbf16>
    %cst = arith.constant dense<0.000000e+00> : vector<8x128xf32>
    %5 = tpu.matmul %3, %4, %cst {dimension_numbers = #tpu.dot_dimension_numbers<[1], [1], [0], [0], [0, 0, 1, 0], [], []>} : vector<8x32xbf16>, vector<128x32xbf16>, vector<8x128xf32> -> vector<8x128xf32>
    %c0_4 = arith.constant 0 : index
    %c0_5 = arith.constant 0 : index
    %6 = vector.load %arg7[%c0_4, %c0_5] : memref<1x128xf32, #tpu.memory_space<vmem>>, vector<1x128xf32>
    %7 = vector.broadcast %6 : vector<1x128xf32> to vector<8x128xf32>
    %8 = arith.mulf %5, %7 : vector<8x128xf32>
    %c0_6 = arith.constant 0 : index
    %c0_7 = arith.constant 0 : index
    %9 = vector.load %arg4[%c0_6, %c0_7] : memref<8x128xf32, #tpu.memory_space<vmem>>, vector<8x128xf32>
    tpu.vector_store %arg4[%c0_6, %c0_7], %8 {strides = array<i32>} : memref<8x128xf32, #tpu.memory_space<vmem>>, vector<8x128xf32>,
    %cst_8 = arith.constant 2.000000e+01 : f32
    %10 = vector.broadcast %cst_8 : f32 to vector<8x128xf32>
    %11 = arith.mulf %8, %10 : vector<8x128xf32>
    %c0_9 = arith.constant 0 : index
    %c0_10 = arith.constant 0 : index
    %12 = vector.load %arg5[%c0_9, %c0_10] : memref<8x128xf32, #tpu.memory_space<vmem>>, vector<8x128xf32>
    tpu.vector_store %arg5[%c0_9, %c0_10], %11 {strides = array<i32>} : memref<8x128xf32, #tpu.memory_space<vmem>>, vector<8x128xf32>,
    return
  }
  func.func @transform_0(%arg0: i32, %arg1: i32) -> (i32, i32) {
    %c0_i32 = arith.constant 0 : i32
    %c0_i32_0 = arith.constant 0 : i32
    return %arg1, %c0_i32 : i32, i32
  }
  func.func @transform_1(%arg0: i32, %arg1: i32) -> (i32, i32) {
    %c0_i32 = arith.constant 0 : i32
    %c0_i32_0 = arith.constant 0 : i32
    return %arg0, %c0_i32 : i32, i32
  }
  func.func @transform_2(%arg0: i32, %arg1: i32) -> (i32, i32) {
    %c0_i32 = arith.constant 0 : i32
    return %arg1, %arg0 : i32, i32
  }
  func.func @transform_3(%arg0: i32, %arg1: i32) -> (i32, i32) {
    %c0_i32 = arith.constant 0 : i32
    return %arg1, %arg0 : i32, i32
  }
  func.func @transform_4(%arg0: i32, %arg1: i32) -> (i32, i32) {
    %c0_i32 = arith.constant 0 : i32
    %c0_i32_0 = arith.constant 0 : i32
    return %c0_i32, %arg0 : i32, i32
  }
}

</mosaic_0001>

<bundles_post_ra>
// kernel: tpu_custom_call.1
= control target key start
LH: loop header
LB: loop body
LE: loop exit
PB: predicated region body
PF: predicated region fallthrough
CT: control target
= control target key end

     0   :  { %10 = vsyncpa [#allocation4], 0  ;;  %v608_v1 = vmov 0.0   ;;  %vm69_vm0 = vcmask 261120   ;;  %vm609_vm1 = vmmov 0   ;;  %s751_s0 = inlined_call_operand.vmem [shape: bf16[8,32], index: 0, kind: input, shape index: {}]   ;;  %s752_s1 = inlined_call_operand.vmem [shape: bf16[128,32], index: 1, kind: input, shape index: {}]   ;;  %s753_s2 = inlined_call_operand.hbm [shape: f32[8,128], index: 2, kind: output, shape index: {0}]   ;;  %s754_s3 = inlined_call_operand.hbm [shape: f32[8,128], index: 3, kind: output, shape index: {1}]   ;;  %s755_s4 = inlined_call_operand.hbm [shape: f32[1,128], index: 4, kind: output, shape index: {2}]  }
   0x1   :  { %v444_v0 = vld [vmem:[%s752_s1 + $0x38] sm:$0xff]   ;;  %471 = vmatprep.subr.mxu0 %v608_v1  ;;  %506 = vmatprep.subr.bf16.mxu1 %v608_v1  ;;  %v443_v5 = vld [vmem:[%s752_s1 + $0x30] sm:$0xff]   ;;  %v442_v13 = vld [vmem:[%s752_s1 + $0x28] sm:$0xff]  }
   0x2   :  { %v436_v2 = vunpack.c.l.bf16 %v444_v0  ;;  %v437_v3 = vunpack.c.h.bf16 %v444_v0  ;;  %v532_v4 = vld [vmem:[%s752_s1 + $0x38] sm:$0xff]   ;;  %503 = vmatprep.mubr.msk.f32.mxu0 %vm609_vm1, %v608_v1  ;;  %522 = vmatprep.mubr.msk.bf16.mxu1 %vm609_vm1, %v608_v1  ;;  %v433_v9 = vunpack.c.h.bf16 %v443_v5  ;;  %v533_v10 = vld [vmem:[%s752_s1 + $0x30] sm:$0xff]   ;;  %v432_v12 = vunpack.c.l.bf16 %v443_v5 }
   0x3   :  { %v285_v7 = vsel %vm69_vm0, %v532_v4, 0  ;;  %v282_v14 = vsel %vm69_vm0, %v533_v10, 0 }
   0x4   :  { %v68_v6 = vmul.f32 %v437_v3, %v437_v3  ;;  %v67_v8 = vmul.f32 %v436_v2, %v436_v2  ;;  %507 = vmatpush3.bf16.xpose.msra.mxu1 %v285_v7  ;;  %v66_v11 = vmul.f32 %v433_v9, %v433_v9 }
   0x5   :  { %508 = vmatprep.subr.bf16.mxu1 %v608_v1 }
   0x6   :  { %472 = vmatpush3.xpose.msk.msra.mxu0 %vm69_vm0, %v68_v6 }
   0x7   :  { %473 = vmatprep.subr.mxu0 %v608_v1 }
   0xa   :  { %474 = vmatpush3.xpose.msk.msra.mxu0 %vm69_vm0, %v67_v8 }
   0xb   :  { %475 = vmatprep.subr.mxu0 %v608_v1 }
   0xc   :  { %11 = vsyncpa [#allocation6], 0  ;;  %v65_v15 = vmul.f32 %v432_v12, %v432_v12  ;;  %v429_v16 = vunpack.c.h.bf16 %v442_v13  ;;  %509 = vmatpush3.bf16.xpose.msra.mxu1 %v282_v14  ;;  %v534_v17 = vld [vmem:[%s752_s1 + $0x28] sm:$0xff]   ;;  %v428_v19 = vunpack.c.l.bf16 %v442_v13  ;;  %v441_v20 = vld [vmem:[%s752_s1 + $0x20] sm:$0xff]   ;;  %v610_v58 = vmov 1.0   ;;  %s612_s23 = smov [#allocation5]  }
   0xd   :  { %510 = vmatprep.subr.bf16.mxu1 %v608_v1  ;;  %v279_v21 = vsel %vm69_vm0, %v534_v17, 0  ;;  %v425_v23 = vunpack.c.h.bf16 %v441_v20  ;;  %v535_v24 = vld [vmem:[%s752_s1 + $0x20] sm:$0xff]   ;;  %v424_v26 = vunpack.c.l.bf16 %v441_v20  ;;  %v440_v27 = vld [vmem:[%s752_s1 + $0x18] sm:$0xff]   ;;  %v439_v34 = vld [vmem:[%s752_s1 + $0x10] sm:$0xff]   ;;  %s354_s24 = sshll.u32 %s612_s23, 4  ;;  %s613_s25 = smov [#allocation7]   ;;  %s355_s24 = int_to_ptr.vmem [resolvable:$true] %s354_s24 }
   0xe   :  { %476 = vmatpush3.xpose.msk.msra.mxu0 %vm69_vm0, %v66_v11  ;;  %v64_v18 = vmul.f32 %v429_v16, %v429_v16  ;;  %v63_v22 = vmul.f32 %v428_v19, %v428_v19  ;;  %v276_v28 = vsel %vm69_vm0, %v535_v24, 0  ;;  %v421_v30 = vunpack.c.h.bf16 %v440_v27  ;;  %v536_v31 = vld [vmem:[%s752_s1 + $0x18] sm:$0xff]   ;;  %v537_v38 = vld [vmem:[%s752_s1 + $0x10] sm:$0xff]   ;;  %v438_v41 = vld [vmem:[%s752_s1 + $0x8] sm:$0xff]   ;;  %s364_s26 = sshll.u32 %s613_s25, 4  ;;  %s365_s26 = int_to_ptr.vmem [resolvable:$true] %s364_s26 }
   0xf   :  { %477 = vmatprep.subr.mxu0 %v608_v1  ;;  %v62_v25 = vmul.f32 %v425_v23, %v425_v23  ;;  %v61_v29 = vmul.f32 %v424_v26, %v424_v26  ;;  %v420_v33 = vunpack.c.l.bf16 %v440_v27  ;;  %v273_v35 = vsel %vm69_vm0, %v536_v31, 0  ;;  %v538_v45 = vld [vmem:[%s752_s1 + $0x8] sm:$0xff]   ;;  %v407_v48 = vld [vmem:[%s752_s1] sm:$0xff]  }
  0x10   :  { %v60_v32 = vmul.f32 %v421_v30, %v421_v30  ;;  %v417_v37 = vunpack.c.h.bf16 %v439_v34  ;;  %v416_v40 = vunpack.c.l.bf16 %v439_v34  ;;  %v270_v42 = vsel %vm69_vm0, %v537_v38, 0  ;;  %v539_v52 = vld [vmem:[%s752_s1] sm:$0xff]  }
  0x11   :  { %v59_v36 = vmul.f32 %v420_v33, %v420_v33  ;;  %v413_v44 = vunpack.c.h.bf16 %v438_v41  ;;  %v412_v47 = vunpack.c.l.bf16 %v438_v41  ;;  %v267_v49 = vsel %vm69_vm0, %v538_v45, 0  ;;  %v202_v57 = vld [vmem:[%s751_s0] sm:$0xf]  ;;  %s611_s0 = smov [#allocation3]  }
  0x12   :  { %478 = vmatpush3.xpose.msk.msra.mxu0 %vm69_vm0, %v65_v15  ;;  %v58_v39 = vmul.f32 %v417_v37, %v417_v37  ;;  %v57_v43 = vmul.f32 %v416_v40, %v416_v40  ;;  %v409_v51 = vunpack.c.h.bf16 %v407_v48  ;;  %v408_v54 = vunpack.c.l.bf16 %v407_v48  ;;  %s344_s1 = sshll.u32 %s611_s0, 4  ;;  %s345_s1 = int_to_ptr.vmem [resolvable:$true] %s344_s1 }
  0x13   :  { %479 = vmatprep.subr.mxu0 %v608_v1  ;;  %v56_v46 = vmul.f32 %v413_v44, %v413_v44  ;;  %v55_v50 = vmul.f32 %v412_v47, %v412_v47  ;;  %v264_v55 = vsel %vm69_vm0, %v539_v52, 0  ;;  %s544_s27 = scalar_lea.vmem %s345_s1, 128  ;;  %p549_p1 = scmp.lt.s32.totalorder %s345_s1, %s345_s1 }
  0x14   :  { %511 = vmatpush3.bf16.xpose.msra.mxu1 %v279_v21  ;;  %v54_v53 = vmul.f32 %v409_v51, %v409_v51  ;;  %v53_v56 = vmul.f32 %v408_v54, %v408_v54  ;;  %p545_p0 = scmp.ne.s32.totalorder %s345_s1, %s544_s27  ;;  %p550_p2 = scmp.lt.s32.totalorder %s544_s27, %s544_s27 }
  0x15   :  { %512 = vmatprep.subr.bf16.mxu1 %v608_v1 }
  0x16   :  { %480 = vmatpush3.xpose.msk.msra.mxu0 %vm69_vm0, %v64_v18  ;;  %p551_p3 = por %p550_p2, %p549_p1 }
  0x17   :  { %481 = vmatprep.subr.mxu0 %v608_v1 }
  0x18   :  { %p552_p4 = pnand %p551_p3, %p545_p0 }
  0x1a   :  { %482 = vmatpush3.xpose.msk.msra.mxu0 %vm69_vm0, %v63_v22 }
  0x1b   :  { %483 = vmatprep.subr.mxu0 %v608_v1 }
  0x1c   :  { %513 = vmatpush3.bf16.xpose.msra.mxu1 %v276_v28 }
  0x1d   :  { %514 = vmatprep.subr.bf16.mxu1 %v608_v1 }
  0x1e   :  { %484 = vmatpush3.xpose.msk.msra.mxu0 %vm69_vm0, %v62_v25 }
  0x1f   :  { %485 = vmatprep.subr.mxu0 %v608_v1 }
  0x22   :  { %486 = vmatpush3.xpose.msk.msra.mxu0 %vm69_vm0, %v61_v29 }
  0x23   :  { %487 = vmatprep.subr.mxu0 %v608_v1 }
  0x24   :  { %515 = vmatpush3.bf16.xpose.msra.mxu1 %v273_v35 }
  0x25   :  { %516 = vmatprep.subr.bf16.mxu1 %v608_v1 }
  0x26   :  { %488 = vmatpush3.xpose.msk.msra.mxu0 %vm69_vm0, %v60_v32 }
  0x27   :  { %489 = vmatprep.subr.mxu0 %v608_v1 }
  0x2a   :  { %490 = vmatpush3.xpose.msk.msra.mxu0 %vm69_vm0, %v59_v36 }
  0x2b   :  { %491 = vmatprep.subr.mxu0 %v608_v1 }
  0x2c   :  { %517 = vmatpush3.bf16.xpose.msra.mxu1 %v270_v42 }
  0x2d   :  { %518 = vmatprep.subr.bf16.mxu1 %v608_v1 }
  0x2e   :  { %492 = vmatpush3.xpose.msk.msra.mxu0 %vm69_vm0, %v58_v39 }
  0x2f   :  { %493 = vmatprep.subr.mxu0 %v608_v1 }
  0x32   :  { %494 = vmatpush3.xpose.msk.msra.mxu0 %vm69_vm0, %v57_v43 }
  0x33   :  { %495 = vmatprep.subr.mxu0 %v608_v1 }
  0x34   :  { %519 = vmatpush3.bf16.xpose.msra.mxu1 %v267_v49 }
  0x35   :  { %520 = vmatprep.subr.bf16.mxu1 %v608_v1 }
  0x36   :  { %496 = vmatpush3.xpose.msk.msra.mxu0 %vm69_vm0, %v56_v46 }
  0x37   :  { %497 = vmatprep.subr.mxu0 %v608_v1 }
  0x3a   :  { %498 = vmatpush3.xpose.msk.msra.mxu0 %vm69_vm0, %v55_v50 }
  0x3b   :  { %499 = vmatprep.subr.mxu0 %v608_v1 }
  0x3c   :  { %521 = vmatpush3.bf16.xpose.msra.mxu1 %v264_v55 }
  0x3e   :  { %500 = vmatpush3.xpose.msk.msra.mxu0 %vm69_vm0, %v54_v53 }
  0x3f   :  { %501 = vmatprep.subr.mxu0 %v608_v1 }
  0x42   :  { %502 = vmatpush3.xpose.msk.msra.mxu0 %vm69_vm0, %v53_v56 }
  0x43   :  { %523 = vmatmul.mubr.msk.bf16.vlgmr.msra.gmra.mxu1 %vm69_vm0, %v202_v57 }
  0x45   :  { %504 = vmatmul.mubr.msk.f32.vlgmr.msra.gmra.mxu0 %vm69_vm0, %v610_v58 }
 0x103   :  { %v321_v60 = vpop.f32.mrf.mxu1 }
 0x105   :  { %v187_v59 = vpop.f32.mrf.mxu0  ;;  %v524_v63 = vpop.f32.mrf.mxu1 }
 0x106   :  { %v191_v61 = vmax.f32 %v187_v59, 1e-12  ;;  %540 = vrsqrt.f32 %v187_v59  ;;  %vm196_vm2 = vcmp.eq.f32.partialorder %v187_v59, inf  ;;  %v199_v5 = vand.u32 2147483648, %v187_v59 }
 0x107   :  { %v505_v62 = vpop.f32.mrf.mxu0  ;;  %v324_v0 = vpop.f32.mrf.mxu1  ;;  %vm198_vm3 = vcmp.eq.f32.partialorder %v187_v59, 0.0 }
 0x108   :  { %542 = vrsqrt.f32 %v191_v61 }
 0x109   :  { %v525_v1 = vpop.f32.mrf.mxu1 }
 0x113   :  { %v541_v2 = vpop.eup %540 }
 0x114   :  { %v195_v3 = vmul.f32 %v541_v2, %v187_v59 }
 0x115   :  { %v543_v4 = vpop.eup %542 }
 0x116   :  { %193 = vst [vmem:[#allocation2] sm:$0x1] %v543_v4  ;;  %v197_v6 = vsel %vm196_vm2, %v187_v59, %v195_v3 }
 0x117   :  { %v200_v7 = vsel %vm198_vm3, %v199_v5, %v197_v6 }
 0x118   :  { %201 = vst [vmem:[#allocation7] sm:$0x1] %v200_v7 }
 0x11d   :  { %v405_v8 = vld [vmem:[#allocation2] ss:$0 sm:$0xff] }
 0x11e   :  { %v334_v9 = vmul.f32 %v405_v8, %v321_v60 }
 0x120   :  { %335 = vst [vmem:[#allocation3] sm:$0xff] %v334_v9  ;;  %v336_v10 = vmul.f32 20.0, %v334_v9 }
 0x121   :  { %555 = shalt.err (!%p552_p4)
}
 0x122   :  { %347 = dma.vmem_to_hbm [thread:$0]  %s345_s1, 128, %s753_s2, [#allocation4]   ;;  %337 = vst [vmem:[#allocation5] sm:$0xff] %v336_v10 }
 0x123   :  { %s564_s30 = scalar_lea.vmem %s355_s24, 128  ;;  %p569_p6 = scmp.lt.s32.totalorder %s355_s24, %s355_s24 }
 0x124   :  { %p565_p5 = scmp.ne.s32.totalorder %s355_s24, %s564_s30  ;;  %p570_p7 = scmp.lt.s32.totalorder %s564_s30, %s564_s30 }
 0x126   :  { %p571_p8 = por %p570_p7, %p569_p6 }
 0x128   :  { %p572_p9 = pnand %p571_p8, %p565_p5 }
 0x12a   :  { %575 = shalt.err (!%p572_p9)
}
 0x12b   :  { %357 = dma.vmem_to_hbm [thread:$0]  %s355_s24, 128, %s754_s3, [#allocation6]  }
 0x12c   :  { %s584_s7 = scalar_lea.vmem %s365_s26, 16  ;;  %s588_s8 = scalar_lea.vmem %s365_s26, 32 }
 0x12d   :  { %p585_p10 = scmp.ne.s32.totalorder %s365_s26, %s584_s7  ;;  %p589_p11 = scmp.lt.s32.totalorder %s365_s26, %s365_s26 }
 0x12e   :  { %p590_p12 = scmp.lt.s32.totalorder %s588_s8, %s584_s7 }
 0x130   :  { %p591_p13 = por %p590_p12, %p589_p11 }
 0x132   :  { %p592_p0 = pnand %p591_p13, %p585_p10 }
 0x134   :  { %595 = shalt.err (!%p592_p0)
}
 0x135   :  { %367 = dma.vmem_to_hbm [thread:$0]  %s365_s26, 16, %s755_s4, [#allocation6]  }
 0x136   :  { %604 = dma.done.wait [#allocation4], 128  }
 0x137   :  { %605 = vsyncadd [#allocation4], 4294967168 }
 0x138   :  { %606 = dma.done.wait [#allocation6], 144  }
 0x139   :  { %607 = vsyncadd [#allocation6], 4294967152 }
 0x13a   :  { %377 = vsyncpa [#allocation4], 1 }
 0x13b   :  { %378 = vsyncpa [#allocation6], 1 }

</bundles_post_ra>
